<compile_context>
chip_gen: v7x
topology: tpu7x:2x2x1
jax: 0.10.0
libtpu: 0.0.40
codegen_flags: <defaults>
</compile_context>

<pallas_src>
import jax
import jax.numpy as jnp
from jax import lax
from jax.experimental import pallas as pl
from jax.experimental.pallas import tpu as pltpu


def _conv1x1_kernel(x_ref, w_ref, b_ref, o_ref):
    # x: [M, Cin], w: [Cout, Cin] (lane-dense), b: [1, Cout] -> o: [M, Cout]
    acc = lax.dot_general(
        x_ref[...], w_ref[...],
        dimension_numbers=(((1,), (1,)), ((), ())),  # contract over Cin (last axis of both)
        preferred_element_type=jnp.float32,
    )
    o_ref[...] = (acc + b_ref[...]).astype(o_ref.dtype)


def prepare_conv1x1_params(weight_oihw, bias):
    """One-time parameter prep: drop the trailing 1x1 dims.
    (Cout, Cin) is already the lane-dense layout the kernel wants, so no
    transpose (and no per-call HBM traffic) is required."""
    Cout, Cin = weight_oihw.shape[0], weight_oihw.shape[1]
    w2d = weight_oihw.reshape(Cout, Cin)   # [Cout, Cin], Cin on lanes
    b2d = bias.reshape(1, Cout)            # [1, Cout]
    return w2d, b2d


def conv2d_1x1(x_nchw, w2d, b2d):
    """1x1 stride-1 Conv2d; semantics identical to torch.nn.Conv2d(Cin, Cout, 1)."""
    N, Cin, H, W = x_nchw.shape
    Cout = w2d.shape[0]
    M = N * H * W

    # NCHW -> (N*H*W, Cin). For H = W = 1 this is a free reshape.
    x2d = jnp.transpose(x_nchw, (0, 2, 3, 1)).reshape(M, Cin)

    out2d = pl.pallas_call(
        _conv1x1_kernel,
        out_shape=jax.ShapeDtypeStruct((M, Cout), x_nchw.dtype),
        in_specs=[
            pl.BlockSpec(memory_space=pltpu.MemorySpace.VMEM),  # x  [M, Cin]
            pl.BlockSpec(memory_space=pltpu.MemorySpace.VMEM),  # w  [Cout, Cin]
            pl.BlockSpec(memory_space=pltpu.MemorySpace.VMEM),  # b  [1, Cout]
        ],
        out_specs=pl.BlockSpec(memory_space=pltpu.MemorySpace.VMEM),
    )(x2d, w2d, b2d)

    # (N*H*W, Cout) -> NCHW
    return out2d.reshape(N, H, W, Cout).transpose(0, 3, 1, 2)


if __name__ == "__main__":
    # Shapes implied by the module's forward: x407 is [1, 1056, 1, 1].
    N, Cin, H, W = 1, 1056, 1, 1
    Cout = 44

    key = jax.random.PRNGKey(0)
    kx, kw, kb = jax.random.split(key, 3)

    x = jax.random.normal(kx, (N, Cin, H, W), dtype=jnp.float32)

    # Conv2d default init: U(-bound, bound), bound = 1/sqrt(fan_in), fan_in = Cin*1*1.
    bound = 1.0 / (Cin ** 0.5)
    weight = jax.random.uniform(kw, (Cout, Cin, 1, 1), dtype=jnp.float32,
                                minval=-bound, maxval=bound)
    bias = jax.random.uniform(kb, (Cout,), dtype=jnp.float32,
                              minval=-bound, maxval=bound)

    # Hoisted, one-time parameter preparation (reshape only; keep f32 to match
    # the PyTorch module's numerics — bf16/fp8 weights would be a further
    # traffic cut if the accuracy budget allowed it).
    w2d, b2d = prepare_conv1x1_params(weight, bias)

    fwd = jax.jit(conv2d_1x1)
    out = jax.block_until_ready(fwd(x, w2d, b2d))

    # Sanity check against a plain-JAX reference of the same conv.
    ref = (jnp.einsum("nchw,oc->nohw", x, weight.reshape(Cout, Cin))
           + bias.reshape(1, Cout, 1, 1))
    assert out.shape == (N, Cout, H, W)
    assert jnp.allclose(out, ref, atol=1e-4, rtol=1e-4)

    print("KERNEL_OK")
</pallas_src>

<mosaic_0001>
module attributes {stable_mosaic.version = 11 : i64} {
  func.func @_conv1x1_kernel(%arg0: memref<1x1056xf32, #tpu.memory_space<vmem>>, %arg1: memref<44x1056xf32, #tpu.memory_space<vmem>>, %arg2: memref<1x44xf32, #tpu.memory_space<vmem>>, %arg3: memref<1x44xf32, #tpu.memory_space<vmem>>) attributes {dimension_semantics = [], scalar_prefetch = 0 : i64, scratch_operands = 0 : i64, tpu.core_type = #tpu.core_type<tc>} {
    %c0 = arith.constant 0 : index
    %c0_0 = arith.constant 0 : index
    %0 = vector.load %arg0[%c0, %c0_0] : memref<1x1056xf32, #tpu.memory_space<vmem>>, vector<1x1056xf32>
    %c0_1 = arith.constant 0 : index
    %c0_2 = arith.constant 0 : index
    %1 = vector.load %arg1[%c0_1, %c0_2] : memref<44x1056xf32, #tpu.memory_space<vmem>>, vector<44x1056xf32>
    %cst = arith.constant dense<0.000000e+00> : vector<1x44xf32>
    %2 = tpu.matmul %0, %1, %cst {dimension_numbers = #tpu.dot_dimension_numbers<[1], [1], [0], [0], [0, 0, 1, 0], [], []>} : vector<1x1056xf32>, vector<44x1056xf32>, vector<1x44xf32> -> vector<1x44xf32>
    %c0_3 = arith.constant 0 : index
    %c0_4 = arith.constant 0 : index
    %3 = vector.load %arg2[%c0_3, %c0_4] : memref<1x44xf32, #tpu.memory_space<vmem>>, vector<1x44xf32>
    %4 = arith.addf %2, %3 : vector<1x44xf32>
    %c0_5 = arith.constant 0 : index
    %c0_6 = arith.constant 0 : index
    %5 = vector.load %arg3[%c0_5, %c0_6] : memref<1x44xf32, #tpu.memory_space<vmem>>, vector<1x44xf32>
    tpu.vector_store %arg3[%c0_5, %c0_6], %4 {strides = array<i32>} : memref<1x44xf32, #tpu.memory_space<vmem>>, vector<1x44xf32>,
    return
  }
}

</mosaic_0001>

<bundles_post_ra>
// kernel: conv2d_1x1.1
= control target key start
LH: loop header
LB: loop body
LE: loop exit
PB: predicated region body
PF: predicated region fallthrough
CT: control target
= control target key end

     0   :  { %8 = vsyncpa [#allocation3], 0  ;;  %s818_s0 = inlined_call_operand.hbm [shape: f32[1,1056], index: 0, kind: input, shape index: {}]   ;;  %s819_s1 = inlined_call_operand.hbm [shape: f32[44,1056], index: 1, kind: input, shape index: {}]   ;;  %s820_s2 = inlined_call_operand.vmem [shape: f32[1,44], index: 2, kind: input, shape index: {}]   ;;  %s821_s3 = inlined_call_operand.hbm [shape: f32[1,44], index: 3, kind: output, shape index: {}]  }
   0x1   :  { %9 = vsyncpa [#allocation6], 0 }
   0x2   :  { %10 = vsyncpa [#allocation4], 0  ;;  %s711_s12 = smov [#allocation2]   ;;  %s712_s14 = smov [#allocation5]  }
   0x3   :  { %s17_s13 = sshll.u32 %s711_s12, 4  ;;  %s26_s15 = sshll.u32 %s712_s14, 4  ;;  %s18_s13 = int_to_ptr.vmem [resolvable:$true] %s17_s13  ;;  %s739_s15 = int_to_ptr.vmem [resolvable:$true] %s26_s15 }
   0x4   :  { %s639_s18 = scalar_lea.hbm %s818_s0, 144 }
   0x5   :  { %p640_p0 = scmp.ne.s32.totalorder %s818_s0, %s639_s18  ;;  %p643_p1 = scmp.lt.u32.totalorder %s639_s18, %s818_s0 }
   0x7   :  { %p645_p2 = pnand %p643_p1, %p640_p0 }
   0x9   :  { %648 = shalt.err (!%p645_p2)
}
   0xa   :  { %s649_s23 = scalar_lea.vmem %s18_s13, 144  ;;  %s653_s24 = scalar_lea.vmem %s18_s13, 160 }
   0xb   :  { %p650_p3 = scmp.ne.s32.totalorder %s18_s13, %s649_s23  ;;  %p654_p4 = scmp.lt.s32.totalorder %s18_s13, %s18_s13 }
   0xc   :  { %p655_p5 = scmp.lt.s32.totalorder %s653_s24, %s649_s23 }
   0xe   :  { %p656_p6 = por %p655_p5, %p654_p4 }
  0x10   :  { %p657_p7 = pnand %p656_p6, %p650_p3 }
  0x12   :  { %660 = shalt.err (!%p657_p7)
}
  0x13   :  { %20 = dma.hbm_to_vmem [thread:$0]  %s818_s0, 144, %s18_s13, [#allocation3]  }
  0x14   :  { %s661_s29 = scalar_lea.hbm %s819_s1, 6912 }
  0x15   :  { %p662_p8 = scmp.ne.s32.totalorder %s819_s1, %s661_s29  ;;  %p665_p9 = scmp.lt.u32.totalorder %s661_s29, %s819_s1 }
  0x17   :  { %p667_p10 = pnand %p665_p9, %p662_p8 }
  0x19   :  { %670 = shalt.err (!%p667_p10)
}
  0x1a   :  { %s671_s7 = scalar_lea.vmem %s739_s15, 6912  ;;  %p676_p12 = scmp.lt.s32.totalorder %s739_s15, %s739_s15 }
  0x1b   :  { %p672_p11 = scmp.ne.s32.totalorder %s739_s15, %s671_s7  ;;  %p677_p13 = scmp.lt.s32.totalorder %s671_s7, %s671_s7 }
  0x1d   :  { %p678_p0 = por %p677_p13, %p676_p12 }
  0x1f   :  { %p679_p1 = pnand %p678_p0, %p672_p11 }
  0x21   :  { %682 = shalt.err (!%p679_p1)
}
  0x22   :  { %s713_s0 = smov 1152   ;;  %s714_s8 = smov 72  }
  0x23   :  { %32 = dma.hbm_to_vmem [thread:$0]  %s819_s1, 6912, %s739_s15, [#allocation6], %s713_s0, %s713_s0, %s714_s8  }
  0x24   :  { %705 = dma.done.wait [#allocation3], 144  }
  0x25   :  { %706 = vsyncadd [#allocation3], 4294967152 }
  0x26   :  { %707 = dma.done.wait [#allocation6], 6912  }
  0x27   :  { %708 = vsyncadd [#allocation6], 4294960384  ;;  %v100_v0 = vlaneseq  ;;  %v44_v1 = vld [vmem:[#allocation5 + $0x8] sm:$0xff]  ;;  %v53_v2 = vld [vmem:[#allocation5 + $0x50] sm:$0xff]  ;;  %vm144_vm0 = vcmask 261120   ;;  %vm716_vm2 = vmmov 0  }
  0x28   :  { %v48_v3 = vld [vmem:[#allocation5 + $0x28] sm:$0xff]  ;;  %v563_v4 = vpack.c.bf16 %v53_v2, %v44_v1  ;;  %v57_v5 = vld [vmem:[#allocation5 + $0x70] sm:$0xff]  ;;  %v43_v6 = vld [vmem:[#allocation5] sm:$0xff]  ;;  %s718_s12 = smov [#allocation7]   ;;  %vm515_vm3 = vcmask 352256  }
  0x29   :  { %v52_v7 = vld [vmem:[#allocation5 + $0x48] sm:$0xff]  ;;  %v770_v8 = vshrl.u32 %v100_v0, 7  ;;  %v587_v9 = vpack.c.bf16 %v57_v5, %v48_v3  ;;  %v47_v11 = vld [vmem:[#allocation5 + $0x20] sm:$0xff]  ;;  %v62_v13 = vld [vmem:[#allocation5 + $0x98] sm:$0xff]  ;;  %s523_s13 = sshll.u32 %s718_s12, 4  ;;  %s524_s13 = int_to_ptr.vmem [resolvable:$true] %s523_s13 }
  0x2a   :  { %v565_v10 = vpack.c.bf16 %v52_v7, %v43_v6  ;;  %v56_v12 = vld [vmem:[#allocation5 + $0x68] sm:$0xff]  ;;  %564 = vmatprep.subr.bf16.mxu1 %v563_v4  ;;  %v71_v15 = vld [vmem:[#allocation5 + $0xe0] sm:$0xff]  ;;  %v66_v16 = vld [vmem:[#allocation5 + $0xb8] sm:$0xff]  ;;  %s683_s14 = scalar_lea.vmem %s524_s13, 16  ;;  %s687_s15 = scalar_lea.vmem %s524_s13, 32 }
  0x2b   :  { %v589_v14 = vpack.c.bf16 %v56_v12, %v47_v11  ;;  %v75_v17 = vld [vmem:[#allocation5 + $0x100] sm:$0xff]  ;;  %588 = vmatprep.subr.bf16.mxu0 %v587_v9  ;;  %v567_v18 = vpack.c.bf16 %v71_v15, %v62_v13  ;;  %v61_v20 = vld [vmem:[#allocation5 + $0x90] sm:$0xff]  ;;  %v70_v21 = vld [vmem:[#allocation5 + $0xd8] sm:$0xff]  ;;  %v106_v23 = vsub.s32 1, %v770_v8  ;;  %v122_v24 = vsub.s32 5, %v770_v8  ;;  %p684_p2 = scmp.ne.s32.totalorder %s524_s13, %s683_s14  ;;  %p688_p3 = scmp.lt.s32.totalorder %s524_s13, %s524_s13 }
  0x2c   :  { %566 = vmatpush1.bf16.xpose.msra.mxu1 %v565_v10  ;;  %v591_v19 = vpack.c.bf16 %v75_v17, %v66_v16  ;;  %v65_v22 = vld [vmem:[#allocation5 + $0xb0] sm:$0xff]  ;;  %v74_v25 = vld [vmem:[#allocation5 + $0xf8] sm:$0xff]  ;;  %v80_v26 = vld [vmem:[#allocation5 + $0x128] sm:$0xff]  ;;  %v569_v30 = vpack.c.bf16 %v70_v21, %v61_v20  ;;  %v102_v49 = vsub.s32 0, %v770_v8  ;;  %v118_v50 = vsub.s32 4, %v770_v8  ;;  %p689_p4 = scmp.lt.s32.totalorder %s687_s15, %s683_s14 }
  0x2d   :  { %590 = vmatpush1.bf16.xpose.msra.mxu0 %v589_v14  ;;  %568 = vmatprep.subr.bf16.mxu1 %v567_v18  ;;  %v89_v27 = vld [vmem:[#allocation5 + $0x170] sm:$0xf]  ;;  %v84_v28 = vld [vmem:[#allocation5 + $0x148] sm:$0xff]  ;;  %v774_v31 = vld [vmem:[#allocation2] sm:$0xff]  ;;  %v593_v32 = vpack.c.bf16 %v74_v25, %v65_v22  ;;  %v114_v57 = vsub.s32 3, %v770_v8  ;;  %v130_v61 = vsub.s32 7, %v770_v8 }
  0x2e   :  { %592 = vmatprep.subr.bf16.mxu0 %v591_v19  ;;  %v93_v29 = vld [vmem:[#allocation5 + $0x190] sm:$0xf]  ;;  %v571_v33 = vpack.c.bf16 %v89_v27, %v80_v26  ;;  %v107_v34 = vrot.slane %v774_v31, %v106_v23  ;;  %v123_v35 = vrot.slane %v774_v31, %v122_v24  ;;  %v79_v37 = vld [vmem:[#allocation5 + $0x120] sm:$0xff]  ;;  %v88_v38 = vld [vmem:[#allocation5 + $0x168] sm:$0xf]  ;;  %v103_v58 = vrot.slane %v774_v31, %v102_v49  ;;  %p690_p5 = por %p689_p4, %p688_p3 }
  0x2f   :  { %v595_v36 = vpack.c.bf16 %v93_v29, %v84_v28  ;;  %v83_v39 = vld [vmem:[#allocation5 + $0x140] sm:$0xff]  ;;  %v92_v40 = vld [vmem:[#allocation5 + $0x188] sm:$0xf]  ;;  %v46_v41 = vld [vmem:[#allocation5 + $0x18] sm:$0xff]  ;;  %v573_v45 = vpack.c.bf16 %v88_v38, %v79_v37  ;;  %v119_v63 = vrot.slane %v774_v31, %v118_v50  ;;  %v115_v3 = vrot.slane %v774_v31, %v114_v57 }
  0x30   :  { %229 = vmatprep.mubr.f32.mxu1 %v107_v34  ;;  %369 = vmatprep.mubr.f32.mxu0 %v123_v35  ;;  %v55_v42 = vld [vmem:[#allocation5 + $0x60] sm:$0xff]  ;;  %v50_v43 = vld [vmem:[#allocation5 + $0x38] sm:$0xff]  ;;  %v597_v46 = vpack.c.bf16 %v92_v40, %v83_v39  ;;  %v45_v51 = vld [vmem:[#allocation5 + $0x10] sm:$0xff]  ;;  %v131_v4 = vrot.slane %v774_v31, %v130_v61  ;;  %v110_v24 = vsub.s32 2, %v770_v8  ;;  %v126_v25 = vsub.s32 6, %v770_v8  ;;  %p691_p6 = pnand %p690_p5, %p684_p2 }
  0x31   :  { %v59_v44 = vld [vmem:[#allocation5 + $0x80] sm:$0xff]  ;;  %v575_v47 = vpack.c.bf16 %v55_v42, %v46_v41  ;;  %v54_v52 = vld [vmem:[#allocation5 + $0x58] sm:$0xff]  ;;  %v49_v53 = vld [vmem:[#allocation5 + $0x30] sm:$0xff]  ;;  %v715_v26 = vmov 0.0|0.0   ;;  %v717_v8 = vmov 0.0  }
  0x32   :  { %v599_v48 = vpack.c.bf16 %v59_v44, %v50_v43  ;;  %v58_v54 = vld [vmem:[#allocation5 + $0x78] sm:$0xff]  ;;  %v64_v55 = vld [vmem:[#allocation5 + $0xa8] sm:$0xff]  ;;  %v73_v56 = vld [vmem:[#allocation5 + $0xf0] sm:$0xff]  ;;  %v577_v62 = vpack.c.bf16 %v54_v52, %v45_v51  ;;  %v111_v29 = vrot.slane %v774_v31, %v110_v24 }
  0x33   :  { %v68_v59 = vld [vmem:[#allocation5 + $0xc8] sm:$0xff]  ;;  %v77_v60 = vld [vmem:[#allocation5 + $0x110] sm:$0xff]  ;;  %v601_v0 = vpack.c.bf16 %v58_v54, %v49_v53  ;;  %v579_v1 = vpack.c.bf16 %v73_v56, %v64_v55  ;;  %v63_v5 = vld [vmem:[#allocation5 + $0xa0] sm:$0xff] }
  0x34   :  { %570 = vmatpush1.bf16.xpose.msra.mxu1 %v569_v30  ;;  %v603_v2 = vpack.c.bf16 %v77_v60, %v68_v59  ;;  %v72_v6 = vld [vmem:[#allocation5 + $0xe8] sm:$0xff]  ;;  %v67_v7 = vld [vmem:[#allocation5 + $0xc0] sm:$0xff]  ;;  %v82_v10 = vld [vmem:[#allocation5 + $0x138] sm:$0xff]  ;;  %v127_v30 = vrot.slane %v774_v31, %v126_v25 }
  0x35   :  { %594 = vmatpush1.bf16.xpose.msra.mxu0 %v593_v32  ;;  %572 = vmatprep.subr.bf16.mxu1 %v571_v33  ;;  %v76_v9 = vld [vmem:[#allocation5 + $0x108] sm:$0xff]  ;;  %v91_v11 = vld [vmem:[#allocation5 + $0x180] sm:$0xf]  ;;  %v86_v12 = vld [vmem:[#allocation5 + $0x158] sm:$0xff]  ;;  %v581_v14 = vpack.c.bf16 %v72_v6, %v63_v5 }
  0x36   :  { %596 = vmatprep.subr.bf16.mxu0 %v595_v36  ;;  %v95_v13 = vld [vmem:[#allocation5 + $0x1a0] sm:$0xf]  ;;  %v605_v15 = vpack.c.bf16 %v76_v9, %v67_v7  ;;  %v583_v16 = vpack.c.bf16 %v91_v11, %v82_v10  ;;  %v81_v18 = vld [vmem:[#allocation5 + $0x130] sm:$0xff]  ;;  %v90_v19 = vld [vmem:[#allocation5 + $0x178] sm:$0xf] }
  0x37   :  { %v607_v17 = vpack.c.bf16 %v95_v13, %v86_v12  ;;  %v85_v20 = vld [vmem:[#allocation5 + $0x150] sm:$0xff]  ;;  %v94_v21 = vld [vmem:[#allocation5 + $0x198] sm:$0xf]  ;;  %v585_v22 = vpack.c.bf16 %v90_v19, %v81_v18  ;;  %v51_v27 = vld [vmem:[#allocation5 + $0x40] sm:$0xff] }
  0x38   :  { %v609_v23 = vpack.c.bf16 %v94_v21, %v85_v20  ;;  %v60_v28 = vld [vmem:[#allocation5 + $0x88] sm:$0xff]  ;;  %vm792_vm1 = vmpackc.low %vm144_vm0, %vm144_vm0  ;;  %v69_v34 = vld [vmem:[#allocation5 + $0xd0] sm:$0xff] }
  0x39   :  { %v612_v32 = vpack.c.bf16 %v60_v28, %v51_v27  ;;  %v78_v35 = vld [vmem:[#allocation5 + $0x118] sm:$0xff]  ;;  %v87_v31 = vld [vmem:[#allocation5 + $0x160] sm:$0xff]  ;;  %v96_v37 = vld [vmem:[#allocation5 + $0x1a8] sm:$0xf] }
  0x3a   :  { %v616_v36 = vpack.c.bf16 %v78_v35, %v69_v34  ;;  %v620_v38 = vpack.c.bf16 %v96_v37, %v87_v31  ;;  %v533_v39 = vld [vmem:[#allocation2 + $0x8] ss:$0 sm:$0xff]  ;;  %v97_v42 = vld [vmem:[%s820_s2] sm:$0x1] }
  0x3c   :  { %574 = vmatpush1.bf16.xpose.msra.mxu1 %v573_v45 }
  0x3d   :  { %598 = vmatpush1.bf16.xpose.msra.mxu0 %v597_v46  ;;  %576 = vmatprep.subr.bf16.mxu1 %v575_v47 }
  0x3e   :  { %600 = vmatprep.subr.bf16.mxu0 %v599_v48 }
  0x43   :  { %230 = vmatmul.mubr.f32.vlgmr.msra.gmra.mrb[0].mxu1 %v103_v58 }
  0x44   :  { %578 = vmatpush1.bf16.xpose.msra.mxu1 %v577_v62  ;;  %370 = vmatmul.mubr.f32.vlgmr.msra.gmra.mrb[0].mxu0 %v119_v63 }
  0x45   :  { %602 = vmatpush1.bf16.xpose.msra.mxu0 %v601_v0  ;;  %580 = vmatprep.subr.bf16.mxu1 %v579_v1 }
  0x46   :  { %604 = vmatprep.subr.bf16.mxu0 %v603_v2  ;;  %299 = vmatprep.mubr.f32.mxu1 %v115_v3 }
  0x47   :  { %439 = vmatprep.mubr.f32.mxu0 %v131_v4 }
  0x4c   :  { %582 = vmatpush1.bf16.xpose.msra.mxu1 %v581_v14 }
  0x4d   :  { %606 = vmatpush1.bf16.xpose.msra.mxu0 %v605_v15  ;;  %584 = vmatprep.subr.bf16.mxu1 %v583_v16 }
  0x4e   :  { %608 = vmatprep.subr.bf16.mxu0 %v607_v17 }
  0x54   :  { %586 = vmatpush1.bf16.xpose.msra.mxu1 %v585_v22 }
  0x55   :  { %610 = vmatpush1.bf16.xpose.msra.mxu0 %v609_v23 }
  0x56   :  { %611 = vmatprep.subr.bf16.mxu0 %v715_v26 }
  0x5b   :  { %300 = vmatmul.mubr.f32.vlgmr.msra.gmra.mrb[0].mxu1 %v111_v29 }
  0x5c   :  { %440 = vmatmul.mubr.f32.vlgmr.msra.gmra.mrb[0].mxu0 %v127_v30 }
  0x5d   :  { %614 = vmatpush3.bf16.xpose.msk.msra.mxu0 %vm792_vm1, %v612_v32  ;;  %560 = vmatprep.mubr.msk.f32.mxu0 %vm716_vm2, %v717_v8 }
  0x5e   :  { %615 = vmatprep.subr.bf16.mxu0 %v715_v26 }
  0x65   :  { %618 = vmatpush3.bf16.xpose.msk.msra.mxu0 %vm792_vm1, %v616_v36 }
  0x66   :  { %619 = vmatprep.subr.bf16.mxu0 %v715_v26 }
  0x6d   :  { %622 = vmatpush3.bf16.xpose.msk.msra.mxu0 %vm792_vm1, %v620_v38 }
  0x74   :  { %561 = vmatmul.mubr.msk.f32.vlgmr.msra.gmra.mrb[0].mxu0 %vm144_vm0, %v533_v39 }
 0x12e   :  { %v301_v40 = vpop.f32.mrb[0].mxu1 }
 0x12f   :  { %v303_v41 = vpop.f32.mrb[1].mxu1  ;;  %v623_v43 = vadd.f32 %v301_v40, %v97_v42 }
 0x147   :  { %v511_v44 = vpop.f32.mrb[0].mxu0 }
 0x148   :  { %v624_v45 = vadd.f32 %v623_v43, %v511_v44  ;;  %v562_v46 = vpop.f32.mrb[1].mxu0 }
 0x14a   :  { %516 = vst.msk [vmem:[#allocation7] sm:$0x1] %vm515_vm3, %v624_v45 }
 0x14b   :  { %694 = shalt.err (!%p691_p6)
}
 0x14c   :  { %s695_s2 = scalar_lea.hbm %s821_s3, 16 }
 0x14d   :  { %p696_p7 = scmp.ne.s32.totalorder %s821_s3, %s695_s2  ;;  %p699_p8 = scmp.lt.u32.totalorder %s695_s2, %s821_s3 }
 0x14f   :  { %p701_p9 = pnand %p699_p8, %p696_p7 }
 0x151   :  { %704 = shalt.err (!%p701_p9)
}
 0x152   :  { %526 = dma.vmem_to_hbm [thread:$0]  %s524_s13, 16, %s821_s3, [#allocation4]  }
 0x153   :  { %709 = dma.done.wait [#allocation4], 16  }
 0x154   :  { %710 = vsyncadd [#allocation4], 4294967280 }
 0x155   :  { %530 = vsyncpa [#allocation3], 1 }
 0x156   :  { %531 = vsyncpa [#allocation6], 1 }
 0x157   :  { %532 = vsyncpa [#allocation4], 1 }

</bundles_post_ra>
